<compile_context>
chip_gen: v7x
topology: tpu7x:2x2x1
jax: 0.10.0
libtpu: 0.0.40
codegen_flags: <defaults>
</compile_context>

<pallas_src>
import functools

import jax
import jax.numpy as jnp
from jax.experimental import pallas as pl
from jax.experimental.pallas import tpu as pltpu

INPUT_SIZE = 4
HIDDEN_SIZE = 10
OUTPUT_SIZE = 4


def _rnn_forecast_kernel(T, B, P,
                         x_ref, wih_t_ref, whh_t_ref, bih_ref, bhh_ref,
                         wfc_t_ref, bfc_ref, out_ref, proj_ref, hs_ref):
    # x_ref:    (T*B, INPUT_SIZE)           time-major, flattened encoder input
    # wih_t_ref:(INPUT_SIZE, HIDDEN_SIZE)   = W_ih^T
    # whh_t_ref:(HIDDEN_SIZE, HIDDEN_SIZE)  = W_hh^T
    # bih_ref / bhh_ref: (1, HIDDEN_SIZE)
    # wfc_t_ref:(HIDDEN_SIZE, OUTPUT_SIZE)  = W_fc^T
    # bfc_ref:  (1, OUTPUT_SIZE)
    # out_ref:  (P*B, OUTPUT_SIZE)          time-major decoder output (flat slab)
    # proj_ref: (T*B, HIDDEN_SIZE)          VMEM scratch: hoisted input projection
    # hs_ref:   (P*B, HIDDEN_SIZE)          VMEM scratch: decoder hidden states
    H = whh_t_ref.shape[0]

    whh_t = whh_t_ref[...]                        # (H, H), loaded once
    b_sum = bih_ref[...] + bhh_ref[...]           # (1, H), broadcasts over batch
    wfc_t = wfc_t_ref[...]                        # (H, OUT)
    bfc = bfc_ref[...]                            # (1, OUT)

    # ---- hoisted encoder input projection: one (T*B, IN) x (IN, H) matmul ----
    proj_ref[...] = (jnp.dot(x_ref[...], wih_t_ref[...],
                             preferred_element_type=jnp.float32) + b_sum)

    # ---- encoder recurrence, fully unrolled (static T) ----
    # h = tanh(proj[t] + h @ W_hh^T); only one tiny matmul per step remains.
    h = jnp.zeros((B, H), dtype=jnp.float32)
    for t in range(T):
        p_t = proj_ref[t * B:(t + 1) * B, :]      # static-offset VMEM load (B, H)
        h = jnp.tanh(p_t + jnp.dot(h, whh_t, preferred_element_type=jnp.float32))

    # ---- decoder recurrence, fully unrolled (static P) ----
    # decoder input is all zeros, so the input-to-hidden matmul vanishes;
    # the fc projection is hoisted below the loop.
    for i in range(P):
        h = jnp.tanh(b_sum + jnp.dot(h, whh_t, preferred_element_type=jnp.float32))
        hs_ref[i * B:(i + 1) * B, :] = h          # static store into VMEM scratch

    # ---- hoisted fc: one (P*B, H) x (H, OUT) matmul + single slab store ----
    out = jnp.dot(hs_ref[...], wfc_t, preferred_element_type=jnp.float32) + bfc
    out_ref[...] = out.astype(out_ref.dtype)


def rnn_forecast(x, params, prediction_timestep):
    """x: (B, T, 4) float32 -> (B, prediction_timestep, 4) float32."""
    w_ih, w_hh, b_ih, b_hh, w_fc, b_fc = params
    B, T, _ = x.shape
    P = int(prediction_timestep)

    # time-major + flattened so the encoder input projection is one 2-D matmul
    x_tm = jnp.transpose(x, (1, 0, 2)).reshape(T * B, INPUT_SIZE)

    vmem = pl.BlockSpec(memory_space=pltpu.MemorySpace.VMEM)
    kernel = functools.partial(_rnn_forecast_kernel, T, B, P)
    out_flat = pl.pallas_call(
        kernel,
        out_shape=jax.ShapeDtypeStruct((P * B, OUTPUT_SIZE), jnp.float32),
        in_specs=[vmem] * 7,
        out_specs=vmem,
        scratch_shapes=[
            pltpu.VMEM((T * B, HIDDEN_SIZE), jnp.float32),   # proj scratch
            pltpu.VMEM((P * B, HIDDEN_SIZE), jnp.float32),   # decoder hidden states
        ],
    )(
        x_tm,
        w_ih.T,                                   # (4, 10)
        w_hh.T,                                   # (10, 10)
        b_ih.reshape(1, HIDDEN_SIZE),
        b_hh.reshape(1, HIDDEN_SIZE),
        w_fc.T,                                   # (10, 4)
        b_fc.reshape(1, OUTPUT_SIZE),
    )
    out_tm = out_flat.reshape(P, B, OUTPUT_SIZE)  # (P, B, 4) time-major
    return jnp.transpose(out_tm, (1, 0, 2))       # back to (B, P, 4)


def init_params(key):
    """Deterministic init mimicking PyTorch's default uniform(-1/sqrt(fan), +)."""
    k = jax.random.split(key, 6)
    s_rnn = 1.0 / jnp.sqrt(HIDDEN_SIZE)
    s_fc = 1.0 / jnp.sqrt(HIDDEN_SIZE)
    w_ih = jax.random.uniform(k[0], (HIDDEN_SIZE, INPUT_SIZE), jnp.float32, -s_rnn, s_rnn)
    w_hh = jax.random.uniform(k[1], (HIDDEN_SIZE, HIDDEN_SIZE), jnp.float32, -s_rnn, s_rnn)
    b_ih = jax.random.uniform(k[2], (HIDDEN_SIZE,), jnp.float32, -s_rnn, s_rnn)
    b_hh = jax.random.uniform(k[3], (HIDDEN_SIZE,), jnp.float32, -s_rnn, s_rnn)
    w_fc = jax.random.uniform(k[4], (OUTPUT_SIZE, HIDDEN_SIZE), jnp.float32, -s_fc, s_fc)
    b_fc = jax.random.uniform(k[5], (OUTPUT_SIZE,), jnp.float32, -s_fc, s_fc)
    return (w_ih, w_hh, b_ih, b_hh, w_fc, b_fc)


def rnn_forecast_ref(x, params, prediction_timestep):
    """Pure-JAX reference mirroring the PyTorch forward."""
    w_ih, w_hh, b_ih, b_hh, w_fc, b_fc = params
    B, T, _ = x.shape

    def cell(h, x_t):
        h_new = jnp.tanh(x_t @ w_ih.T + b_ih + h @ w_hh.T + b_hh)
        return h_new, h_new

    h0 = jnp.zeros((B, HIDDEN_SIZE), jnp.float32)
    h, _ = jax.lax.scan(cell, h0, jnp.transpose(x, (1, 0, 2)))
    zeros = jnp.zeros((prediction_timestep, B, INPUT_SIZE), jnp.float32)
    _, hs = jax.lax.scan(cell, h, zeros)          # (P, B, H)
    out = hs @ w_fc.T + b_fc                      # (P, B, 4)
    return jnp.transpose(out, (1, 0, 2))


if __name__ == "__main__":
    B, T, P = 2, 8, 5
    key = jax.random.PRNGKey(0)
    k_x, k_p = jax.random.split(key)

    x = jax.random.normal(k_x, (B, T, INPUT_SIZE), dtype=jnp.float32)
    params = init_params(k_p)

    out = rnn_forecast(x, params, P)
    out = jax.block_until_ready(out)

    ref = jax.block_until_ready(rnn_forecast_ref(x, params, P))
    assert out.shape == (B, P, OUTPUT_SIZE), out.shape
    assert jnp.allclose(out, ref, atol=1e-5, rtol=1e-5), "mismatch vs reference"

    print("KERNEL_OK")
</pallas_src>

<mosaic_0001>
module attributes {stable_mosaic.version = 11 : i64} {
  func.func @_rnn_forecast_kernel(%arg0: memref<16x4xf32, #tpu.memory_space<vmem>>, %arg1: memref<4x10xf32, #tpu.memory_space<vmem>>, %arg2: memref<10x10xf32, #tpu.memory_space<vmem>>, %arg3: memref<1x10xf32, #tpu.memory_space<vmem>>, %arg4: memref<1x10xf32, #tpu.memory_space<vmem>>, %arg5: memref<10x4xf32, #tpu.memory_space<vmem>>, %arg6: memref<1x4xf32, #tpu.memory_space<vmem>>, %arg7: memref<10x4xf32, #tpu.memory_space<vmem>>, %arg8: memref<16x10xf32, #tpu.memory_space<vmem>>, %arg9: memref<10x10xf32, #tpu.memory_space<vmem>>) attributes {dimension_semantics = [], scalar_prefetch = 0 : i64, scratch_operands = 2 : i64, tpu.core_type = #tpu.core_type<tc>} {
    %c0 = arith.constant 0 : index
    %c0_0 = arith.constant 0 : index
    %0 = vector.load %arg2[%c0, %c0_0] : memref<10x10xf32, #tpu.memory_space<vmem>>, vector<10x10xf32>
    %c0_1 = arith.constant 0 : index
    %c0_2 = arith.constant 0 : index
    %1 = vector.load %arg3[%c0_1, %c0_2] : memref<1x10xf32, #tpu.memory_space<vmem>>, vector<1x10xf32>
    %c0_3 = arith.constant 0 : index
    %c0_4 = arith.constant 0 : index
    %2 = vector.load %arg4[%c0_3, %c0_4] : memref<1x10xf32, #tpu.memory_space<vmem>>, vector<1x10xf32>
    %3 = arith.addf %1, %2 : vector<1x10xf32>
    %c0_5 = arith.constant 0 : index
    %c0_6 = arith.constant 0 : index
    %4 = vector.load %arg5[%c0_5, %c0_6] : memref<10x4xf32, #tpu.memory_space<vmem>>, vector<10x4xf32>
    %c0_7 = arith.constant 0 : index
    %c0_8 = arith.constant 0 : index
    %5 = vector.load %arg6[%c0_7, %c0_8] : memref<1x4xf32, #tpu.memory_space<vmem>>, vector<1x4xf32>
    %c0_9 = arith.constant 0 : index
    %c0_10 = arith.constant 0 : index
    %6 = vector.load %arg0[%c0_9, %c0_10] : memref<16x4xf32, #tpu.memory_space<vmem>>, vector<16x4xf32>
    %c0_11 = arith.constant 0 : index
    %c0_12 = arith.constant 0 : index
    %7 = vector.load %arg1[%c0_11, %c0_12] : memref<4x10xf32, #tpu.memory_space<vmem>>, vector<4x10xf32>
    %cst = arith.constant dense<0.000000e+00> : vector<16x10xf32>
    %8 = tpu.matmul %6, %7, %cst {dimension_numbers = #tpu.dot_dimension_numbers<[1], [0], [0], [1], [0, 0, 1, 1], [], []>} : vector<16x4xf32>, vector<4x10xf32>, vector<16x10xf32> -> vector<16x10xf32>
    %9 = vector.broadcast %3 : vector<1x10xf32> to vector<16x10xf32>
    %10 = arith.addf %8, %9 : vector<16x10xf32>
    %c0_13 = arith.constant 0 : index
    %c0_14 = arith.constant 0 : index
    %11 = vector.load %arg8[%c0_13, %c0_14] : memref<16x10xf32, #tpu.memory_space<vmem>>, vector<16x10xf32>
    tpu.vector_store %arg8[%c0_13, %c0_14], %10 {strides = array<i32>} : memref<16x10xf32, #tpu.memory_space<vmem>>, vector<16x10xf32>,
    %cst_15 = arith.constant 0.000000e+00 : f32
    %12 = vector.broadcast %cst_15 : f32 to vector<2x10xf32>
    %c0_16 = arith.constant 0 : index
    %c0_17 = arith.constant 0 : index
    %13 = vector.load %arg8[%c0_16, %c0_17] : memref<16x10xf32, #tpu.memory_space<vmem>>, vector<2x10xf32>
    %cst_18 = arith.constant dense<0.000000e+00> : vector<2x10xf32>
    %14 = tpu.matmul %12, %0, %cst_18 {dimension_numbers = #tpu.dot_dimension_numbers<[1], [0], [0], [1], [0, 0, 1, 1], [], []>} : vector<2x10xf32>, vector<10x10xf32>, vector<2x10xf32> -> vector<2x10xf32>
    %15 = arith.addf %13, %14 : vector<2x10xf32>
    %16 = math.tanh %15 : vector<2x10xf32>
    %c2 = arith.constant 2 : index
    %c0_19 = arith.constant 0 : index
    %17 = vector.load %arg8[%c2, %c0_19] : memref<16x10xf32, #tpu.memory_space<vmem>>, vector<2x10xf32>
    %cst_20 = arith.constant dense<0.000000e+00> : vector<2x10xf32>
    %18 = tpu.matmul %16, %0, %cst_20 {dimension_numbers = #tpu.dot_dimension_numbers<[1], [0], [0], [1], [0, 0, 1, 1], [], []>} : vector<2x10xf32>, vector<10x10xf32>, vector<2x10xf32> -> vector<2x10xf32>
    %19 = arith.addf %17, %18 : vector<2x10xf32>
    %20 = math.tanh %19 : vector<2x10xf32>
    %c4 = arith.constant 4 : index
    %c0_21 = arith.constant 0 : index
    %21 = vector.load %arg8[%c4, %c0_21] : memref<16x10xf32, #tpu.memory_space<vmem>>, vector<2x10xf32>
    %cst_22 = arith.constant dense<0.000000e+00> : vector<2x10xf32>
    %22 = tpu.matmul %20, %0, %cst_22 {dimension_numbers = #tpu.dot_dimension_numbers<[1], [0], [0], [1], [0, 0, 1, 1], [], []>} : vector<2x10xf32>, vector<10x10xf32>, vector<2x10xf32> -> vector<2x10xf32>
    %23 = arith.addf %21, %22 : vector<2x10xf32>
    %24 = math.tanh %23 : vector<2x10xf32>
    %c6 = arith.constant 6 : index
    %c0_23 = arith.constant 0 : index
    %25 = vector.load %arg8[%c6, %c0_23] : memref<16x10xf32, #tpu.memory_space<vmem>>, vector<2x10xf32>
    %cst_24 = arith.constant dense<0.000000e+00> : vector<2x10xf32>
    %26 = tpu.matmul %24, %0, %cst_24 {dimension_numbers = #tpu.dot_dimension_numbers<[1], [0], [0], [1], [0, 0, 1, 1], [], []>} : vector<2x10xf32>, vector<10x10xf32>, vector<2x10xf32> -> vector<2x10xf32>
    %27 = arith.addf %25, %26 : vector<2x10xf32>
    %28 = math.tanh %27 : vector<2x10xf32>
    %c8 = arith.constant 8 : index
    %c0_25 = arith.constant 0 : index
    %29 = vector.load %arg8[%c8, %c0_25] : memref<16x10xf32, #tpu.memory_space<vmem>>, vector<2x10xf32>
    %cst_26 = arith.constant dense<0.000000e+00> : vector<2x10xf32>
    %30 = tpu.matmul %28, %0, %cst_26 {dimension_numbers = #tpu.dot_dimension_numbers<[1], [0], [0], [1], [0, 0, 1, 1], [], []>} : vector<2x10xf32>, vector<10x10xf32>, vector<2x10xf32> -> vector<2x10xf32>
    %31 = arith.addf %29, %30 : vector<2x10xf32>
    %32 = math.tanh %31 : vector<2x10xf32>
    %c10 = arith.constant 10 : index
    %c0_27 = arith.constant 0 : index
    %33 = vector.load %arg8[%c10, %c0_27] : memref<16x10xf32, #tpu.memory_space<vmem>>, vector<2x10xf32>
    %cst_28 = arith.constant dense<0.000000e+00> : vector<2x10xf32>
    %34 = tpu.matmul %32, %0, %cst_28 {dimension_numbers = #tpu.dot_dimension_numbers<[1], [0], [0], [1], [0, 0, 1, 1], [], []>} : vector<2x10xf32>, vector<10x10xf32>, vector<2x10xf32> -> vector<2x10xf32>
    %35 = arith.addf %33, %34 : vector<2x10xf32>
    %36 = math.tanh %35 : vector<2x10xf32>
    %c12 = arith.constant 12 : index
    %c0_29 = arith.constant 0 : index
    %37 = vector.load %arg8[%c12, %c0_29] : memref<16x10xf32, #tpu.memory_space<vmem>>, vector<2x10xf32>
    %cst_30 = arith.constant dense<0.000000e+00> : vector<2x10xf32>
    %38 = tpu.matmul %36, %0, %cst_30 {dimension_numbers = #tpu.dot_dimension_numbers<[1], [0], [0], [1], [0, 0, 1, 1], [], []>} : vector<2x10xf32>, vector<10x10xf32>, vector<2x10xf32> -> vector<2x10xf32>
    %39 = arith.addf %37, %38 : vector<2x10xf32>
    %40 = math.tanh %39 : vector<2x10xf32>
    %c14 = arith.constant 14 : index
    %c0_31 = arith.constant 0 : index
    %41 = vector.load %arg8[%c14, %c0_31] : memref<16x10xf32, #tpu.memory_space<vmem>>, vector<2x10xf32>
    %cst_32 = arith.constant dense<0.000000e+00> : vector<2x10xf32>
    %42 = tpu.matmul %40, %0, %cst_32 {dimension_numbers = #tpu.dot_dimension_numbers<[1], [0], [0], [1], [0, 0, 1, 1], [], []>} : vector<2x10xf32>, vector<10x10xf32>, vector<2x10xf32> -> vector<2x10xf32>
    %43 = arith.addf %41, %42 : vector<2x10xf32>
    %44 = math.tanh %43 : vector<2x10xf32>
    %cst_33 = arith.constant dense<0.000000e+00> : vector<2x10xf32>
    %45 = tpu.matmul %44, %0, %cst_33 {dimension_numbers = #tpu.dot_dimension_numbers<[1], [0], [0], [1], [0, 0, 1, 1], [], []>} : vector<2x10xf32>, vector<10x10xf32>, vector<2x10xf32> -> vector<2x10xf32>
    %46 = vector.broadcast %3 : vector<1x10xf32> to vector<2x10xf32>
    %47 = arith.addf %46, %45 : vector<2x10xf32>
    %48 = math.tanh %47 : vector<2x10xf32>
    %c0_34 = arith.constant 0 : index
    %c0_35 = arith.constant 0 : index
    %49 = vector.load %arg9[%c0_34, %c0_35] : memref<10x10xf32, #tpu.memory_space<vmem>>, vector<2x10xf32>
    tpu.vector_store %arg9[%c0_34, %c0_35], %48 {strides = array<i32>} : memref<10x10xf32, #tpu.memory_space<vmem>>, vector<2x10xf32>,
    %cst_36 = arith.constant dense<0.000000e+00> : vector<2x10xf32>
    %50 = tpu.matmul %48, %0, %cst_36 {dimension_numbers = #tpu.dot_dimension_numbers<[1], [0], [0], [1], [0, 0, 1, 1], [], []>} : vector<2x10xf32>, vector<10x10xf32>, vector<2x10xf32> -> vector<2x10xf32>
    %51 = vector.broadcast %3 : vector<1x10xf32> to vector<2x10xf32>
    %52 = arith.addf %51, %50 : vector<2x10xf32>
    %53 = math.tanh %52 : vector<2x10xf32>
    %c2_37 = arith.constant 2 : index
    %c0_38 = arith.constant 0 : index
    %54 = vector.load %arg9[%c2_37, %c0_38] : memref<10x10xf32, #tpu.memory_space<vmem>>, vector<2x10xf32>
    tpu.vector_store %arg9[%c2_37, %c0_38], %53 {strides = array<i32>} : memref<10x10xf32, #tpu.memory_space<vmem>>, vector<2x10xf32>,
    %cst_39 = arith.constant dense<0.000000e+00> : vector<2x10xf32>
    %55 = tpu.matmul %53, %0, %cst_39 {dimension_numbers = #tpu.dot_dimension_numbers<[1], [0], [0], [1], [0, 0, 1, 1], [], []>} : vector<2x10xf32>, vector<10x10xf32>, vector<2x10xf32> -> vector<2x10xf32>
    %56 = vector.broadcast %3 : vector<1x10xf32> to vector<2x10xf32>
    %57 = arith.addf %56, %55 : vector<2x10xf32>
    %58 = math.tanh %57 : vector<2x10xf32>
    %c4_40 = arith.constant 4 : index
    %c0_41 = arith.constant 0 : index
    %59 = vector.load %arg9[%c4_40, %c0_41] : memref<10x10xf32, #tpu.memory_space<vmem>>, vector<2x10xf32>
    tpu.vector_store %arg9[%c4_40, %c0_41], %58 {strides = array<i32>} : memref<10x10xf32, #tpu.memory_space<vmem>>, vector<2x10xf32>,
    %cst_42 = arith.constant dense<0.000000e+00> : vector<2x10xf32>
    %60 = tpu.matmul %58, %0, %cst_42 {dimension_numbers = #tpu.dot_dimension_numbers<[1], [0], [0], [1], [0, 0, 1, 1], [], []>} : vector<2x10xf32>, vector<10x10xf32>, vector<2x10xf32> -> vector<2x10xf32>
    %61 = vector.broadcast %3 : vector<1x10xf32> to vector<2x10xf32>
    %62 = arith.addf %61, %60 : vector<2x10xf32>
    %63 = math.tanh %62 : vector<2x10xf32>
    %c6_43 = arith.constant 6 : index
    %c0_44 = arith.constant 0 : index
    %64 = vector.load %arg9[%c6_43, %c0_44] : memref<10x10xf32, #tpu.memory_space<vmem>>, vector<2x10xf32>
    tpu.vector_store %arg9[%c6_43, %c0_44], %63 {strides = array<i32>} : memref<10x10xf32, #tpu.memory_space<vmem>>, vector<2x10xf32>,
    %cst_45 = arith.constant dense<0.000000e+00> : vector<2x10xf32>
    %65 = tpu.matmul %63, %0, %cst_45 {dimension_numbers = #tpu.dot_dimension_numbers<[1], [0], [0], [1], [0, 0, 1, 1], [], []>} : vector<2x10xf32>, vector<10x10xf32>, vector<2x10xf32> -> vector<2x10xf32>
    %66 = vector.broadcast %3 : vector<1x10xf32> to vector<2x10xf32>
    %67 = arith.addf %66, %65 : vector<2x10xf32>
    %68 = math.tanh %67 : vector<2x10xf32>
    %c8_46 = arith.constant 8 : index
    %c0_47 = arith.constant 0 : index
    %69 = vector.load %arg9[%c8_46, %c0_47] : memref<10x10xf32, #tpu.memory_space<vmem>>, vector<2x10xf32>
    tpu.vector_store %arg9[%c8_46, %c0_47], %68 {strides = array<i32>} : memref<10x10xf32, #tpu.memory_space<vmem>>, vector<2x10xf32>,
    %c0_48 = arith.constant 0 : index
    %c0_49 = arith.constant 0 : index
    %70 = vector.load %arg9[%c0_48, %c0_49] : memref<10x10xf32, #tpu.memory_space<vmem>>, vector<10x10xf32>
    %cst_50 = arith.constant dense<0.000000e+00> : vector<10x4xf32>
    %71 = tpu.matmul %70, %4, %cst_50 {dimension_numbers = #tpu.dot_dimension_numbers<[1], [0], [0], [1], [0, 0, 1, 1], [], []>} : vector<10x10xf32>, vector<10x4xf32>, vector<10x4xf32> -> vector<10x4xf32>
    %72 = vector.broadcast %5 : vector<1x4xf32> to vector<10x4xf32>
    %73 = arith.addf %71, %72 : vector<10x4xf32>
    %c0_51 = arith.constant 0 : index
    %c0_52 = arith.constant 0 : index
    %74 = vector.load %arg7[%c0_51, %c0_52] : memref<10x4xf32, #tpu.memory_space<vmem>>, vector<10x4xf32>
    tpu.vector_store %arg7[%c0_51, %c0_52], %73 {strides = array<i32>} : memref<10x4xf32, #tpu.memory_space<vmem>>, vector<10x4xf32>,
    return
  }
}

</mosaic_0001>

<bundles_post_ra>
// kernel: tpu_custom_call.1
= control target key start
LH: loop header
LB: loop body
LE: loop exit
PB: predicated region body
PF: predicated region fallthrough
CT: control target
= control target key end

     0   :  { %vm50_vm0 = vcmask 1043456   ;;  %vm43_vm1 = vcmask 31744   ;;  %vm136_vm2 = vcmask 1041408   ;;  %v1493_v3 = vmov 0.0|0.0   ;;  %s1697_s1 = inlined_call_operand.vmem [shape: f32[4,10], index: 1, kind: input, shape index: {}]   ;;  %s1698_s0 = inlined_call_operand.vmem [shape: f32[16,4], index: 0, kind: input, shape index: {}]   ;;  %s1699_s2 = inlined_call_operand.vmem [shape: f32[10,10], index: 2, kind: input, shape index: {}]   ;;  %s1700_s3 = inlined_call_operand.vmem [shape: f32[1,10], index: 3, kind: input, shape index: {}]   ;;  %s1701_s4 = inlined_call_operand.vmem [shape: f32[1,10], index: 4, kind: input, shape index: {}]   ;;  %s1702_s5 = inlined_call_operand.vmem [shape: f32[10,4], index: 5, kind: input, shape index: {}]   ;;  %s1703_s6 = inlined_call_operand.vmem [shape: f32[1,4], index: 6, kind: input, shape index: {}]   ;;  %s1704_s7 = inlined_call_operand.vmem [shape: f32[10,4], index: 7, kind: output, shape index: {}]  }
   0x1   :  { %v36_v0 = vld [vmem:[%s1697_s1] sm:$0xf]  ;;  %v35_v2 = vld [vmem:[%s1698_s0 + $0x8] sm:$0xff]  ;;  %1405 = vmatprep.subr.bf16.mxu1 %v1493_v3  ;;  %vm1494_vm3 = vmmov 1   ;;  %vm1495_vm5 = vmmov 0   ;;  %v1496_v8 = vmov 0.0   ;;  %v38_v9 = vlaneseq }
   0x2   :  { %v34_v1 = vld [vmem:[%s1698_s0] sm:$0xff]  ;;  %1302 = vmatprep.subr.msk.mxu0 %vm50_vm0, %v36_v0  ;;  %v27_v5 = vld [vmem:[%s1699_s2 + $0x8] sm:$0x3]  ;;  %vm1555_vm4 = vmpackc.low %vm136_vm2, %vm1494_vm3  ;;  %1311 = vmatprep.mubr.msk.f32.mxu1 %vm1495_vm5, %v1496_v8  ;;  %vm129_vm6 = vcmask 80896   ;;  %vm819_vm7 = vcmask 74752   ;;  %vm1218_vm8 = vcmask 25600  }
   0x3   :  { %1304 = vmatprep.mubr.msk.f32.mxu0 %vm43_vm1, %v34_v1  ;;  %v26_v4 = vld [vmem:[%s1699_s2] sm:$0xff]  ;;  %1303 = vmatpush3.msk.msra.mxu0 %vm50_vm0, %v36_v0  ;;  %v39_v10 = vshrl.u32 %v38_v9, 7 }
   0x4   :  { %v1560_v7 = vpack.c.bf16 %v27_v5, %v26_v4  ;;  %1305 = vmatmul.mubr.msk.f32.vlgmr.msra.gmra.mrb[0].mxu0 %vm43_vm1, %v35_v2  ;;  %1409 = vmatprep.subr.bf16.mxu0 %v1493_v3  ;;  %v28_v11 = vld [vmem:[%s1700_s3] sm:$0x1] }
   0x5   :  { %1318 = vmatprep.mubr.msk.f32.mxu0 %vm1495_vm5, %v1496_v8  ;;  %v29_v12 = vld [vmem:[%s1701_s4] sm:$0x1]  ;;  %v40_v14 = vsub.s32 0, %v39_v10 }
   0x6   :  { %1408 = vmatpush3.bf16.msk.msra.mxu1 %vm1555_vm4, %v1560_v7  ;;  %1412 = vmatpush3.bf16.msk.msra.mxu0 %vm1555_vm4, %v1560_v7  ;;  %v30_v13 = vadd.f32 %v29_v12, %v28_v11 }
   0x7   :  { %1413 = vmatprep.subr.bf16.mxu1 %v1493_v3  ;;  %1417 = vmatprep.subr.bf16.mxu0 %v1493_v3 }
   0x8   :  { %v1589_v15 = vrot.slane %v30_v13, %v40_v14 }
   0x9   :  { %1312 = vmatmul.mubr.f32.vlgmr.msra.gmra.mrb[0].mxu1 %v1496_v8 }
   0xa   :  { %1416 = vmatpush3.bf16.msk.msra.mxu1 %vm1555_vm4, %v1560_v7  ;;  %1325 = vmatprep.mubr.msk.f32.mxu1 %vm1495_vm5, %v1496_v8 }
   0xb   :  { %1421 = vmatprep.subr.bf16.mxu1 %v1493_v3 }
  0xd7   :  { %v1306_v16 = vpop.f32.mrb[0].mxu0 }
  0xd8   :  { %v126_v17 = vadd.f32 %v1306_v16, %v1589_v15  ;;  %v120_v18 = vpop.f32.mrb[1].mxu0  ;;  %v32_v16 = vld [vmem:[%s1702_s5 + $0x8] sm:$0x3] }
  0xd9   :  { %v121_v19 = vadd.f32 %v120_v18, %v1589_v15 }
  0xda   :  { %131 = vst.msk [vmem:[#allocation2 + $0x8] sm:$0xff] %vm129_vm6, %v126_v17 }
  0xdb   :  { %130 = vst.msk [vmem:[#allocation2] sm:$0xff] %vm129_vm6, %v121_v19 }
  0xdc   :  { %v206_v20 = vpop.f32.mrb[0].mxu1 }
  0xdd   :  { %v1313_v21 = vpop.f32.mrb[1].mxu1 }
  0xe1   :  { %v440_v40 = vld [vmem:[#allocation2 + $0x8] sm:$0x3]  ;;  %v516_v45 = vld [vmem:[#allocation2 + $0xa] sm:$0x3]  ;;  %v592_v50 = vld [vmem:[#allocation2 + $0xc] sm:$0x3] }
  0xe2   :  { %v132_v22 = vld [vmem:[#allocation2] sm:$0x3]  ;;  %v212_v25 = vld [vmem:[#allocation2 + $0x2] sm:$0x3]  ;;  %v288_v30 = vld [vmem:[#allocation2 + $0x4] sm:$0x3] }
  0xe3   :  { %v210_v23 = vadd.f32 %v206_v20, %v132_v22  ;;  %v364_v35 = vld [vmem:[#allocation2 + $0x6] sm:$0x3]  ;;  %v668_v55 = vld [vmem:[#allocation2 + $0xe] sm:$0x3] }
  0xe5   :  { %1467 = vtanh.f32 %v210_v23  ;;  %v1252_v23 = vld [vmem:[%s1703_s6] ss:$0 sm:$0xff] }
  0xef   :  { %v1468_v24 = vpop.eup %1467 }
  0xf0   :  { %1319 = vmatmul.mubr.msk.f32.vlgmr.msra.gmra.mrb[2].mxu0 %vm129_vm6, %v1468_v24 }
  0xf1   :  { %1420 = vmatpush3.bf16.msk.msra.mxu0 %vm1555_vm4, %v1560_v7  ;;  %1332 = vmatprep.mubr.msk.f32.mxu0 %vm1495_vm5, %v1496_v8 }
  0xf2   :  { %1425 = vmatprep.subr.bf16.mxu0 %v1493_v3 }
 0x1c3   :  { %v282_v26 = vpop.f32.mrb[2].mxu0 }
 0x1c4   :  { %v286_v27 = vadd.f32 %v282_v26, %v212_v25  ;;  %v1320_v28 = vpop.f32.mrb[3].mxu0 }
 0x1c6   :  { %1469 = vtanh.f32 %v286_v27 }
 0x1d0   :  { %v1470_v29 = vpop.eup %1469 }
 0x1d1   :  { %1326 = vmatmul.mubr.msk.f32.vlgmr.msra.gmra.mrb[2].mxu1 %vm129_vm6, %v1470_v29 }
 0x1d2   :  { %1424 = vmatpush3.bf16.msk.msra.mxu1 %vm1555_vm4, %v1560_v7  ;;  %1339 = vmatprep.mubr.msk.f32.mxu1 %vm1495_vm5, %v1496_v8 }
 0x1d3   :  { %1429 = vmatprep.subr.bf16.mxu1 %v1493_v3 }
 0x2a4   :  { %v358_v31 = vpop.f32.mrb[2].mxu1 }
 0x2a5   :  { %v362_v32 = vadd.f32 %v358_v31, %v288_v30  ;;  %v1327_v33 = vpop.f32.mrb[3].mxu1 }
 0x2a7   :  { %1471 = vtanh.f32 %v362_v32 }
 0x2b1   :  { %v1472_v34 = vpop.eup %1471 }
 0x2b2   :  { %1333 = vmatmul.mubr.msk.f32.vlgmr.msra.gmra.mrb[4].mxu0 %vm129_vm6, %v1472_v34 }
 0x2b3   :  { %1428 = vmatpush3.bf16.msk.msra.mxu0 %vm1555_vm4, %v1560_v7  ;;  %1346 = vmatprep.mubr.msk.f32.mxu0 %vm1495_vm5, %v1496_v8 }
 0x2b4   :  { %1433 = vmatprep.subr.bf16.mxu0 %v1493_v3 }
 0x385   :  { %v434_v36 = vpop.f32.mrb[4].mxu0 }
 0x386   :  { %v438_v37 = vadd.f32 %v434_v36, %v364_v35  ;;  %v1334_v38 = vpop.f32.mrb[5].mxu0 }
 0x388   :  { %1473 = vtanh.f32 %v438_v37 }
 0x392   :  { %v1474_v39 = vpop.eup %1473 }
 0x393   :  { %1340 = vmatmul.mubr.msk.f32.vlgmr.msra.gmra.mrb[4].mxu1 %vm129_vm6, %v1474_v39 }
 0x394   :  { %1432 = vmatpush3.bf16.msk.msra.mxu1 %vm1555_vm4, %v1560_v7  ;;  %1353 = vmatprep.mubr.msk.f32.mxu1 %vm1495_vm5, %v1496_v8 }
 0x395   :  { %1437 = vmatprep.subr.bf16.mxu1 %v1493_v3 }
 0x466   :  { %v510_v41 = vpop.f32.mrb[4].mxu1 }
 0x467   :  { %v514_v42 = vadd.f32 %v510_v41, %v440_v40  ;;  %v1341_v43 = vpop.f32.mrb[5].mxu1 }
 0x469   :  { %1475 = vtanh.f32 %v514_v42 }
 0x473   :  { %v1476_v44 = vpop.eup %1475 }
 0x474   :  { %1347 = vmatmul.mubr.msk.f32.vlgmr.msra.gmra.mrb[6].mxu0 %vm129_vm6, %v1476_v44 }
 0x475   :  { %1436 = vmatpush3.bf16.msk.msra.mxu0 %vm1555_vm4, %v1560_v7  ;;  %1360 = vmatprep.mubr.msk.f32.mxu0 %vm1495_vm5, %v1496_v8 }
 0x476   :  { %1441 = vmatprep.subr.bf16.mxu0 %v1493_v3 }
 0x547   :  { %v586_v46 = vpop.f32.mrb[6].mxu0 }
 0x548   :  { %v590_v47 = vadd.f32 %v586_v46, %v516_v45  ;;  %v1348_v48 = vpop.f32.mrb[7].mxu0 }
 0x54a   :  { %1477 = vtanh.f32 %v590_v47 }
 0x554   :  { %v1478_v49 = vpop.eup %1477 }
 0x555   :  { %1354 = vmatmul.mubr.msk.f32.vlgmr.msra.gmra.mrb[6].mxu1 %vm129_vm6, %v1478_v49 }
 0x556   :  { %1440 = vmatpush3.bf16.msk.msra.mxu1 %vm1555_vm4, %v1560_v7  ;;  %1367 = vmatprep.mubr.msk.f32.mxu1 %vm1495_vm5, %v1496_v8 }
 0x557   :  { %1445 = vmatprep.subr.bf16.mxu1 %v1493_v3 }
 0x628   :  { %v662_v51 = vpop.f32.mrb[6].mxu1 }
 0x629   :  { %v666_v52 = vadd.f32 %v662_v51, %v592_v50  ;;  %v1355_v53 = vpop.f32.mrb[7].mxu1 }
 0x62b   :  { %1479 = vtanh.f32 %v666_v52 }
 0x635   :  { %v1480_v54 = vpop.eup %1479 }
 0x636   :  { %1361 = vmatmul.mubr.msk.f32.vlgmr.msra.gmra.mrb[8].mxu0 %vm129_vm6, %v1480_v54 }
 0x637   :  { %1444 = vmatpush3.bf16.msk.msra.mxu0 %vm1555_vm4, %v1560_v7  ;;  %1374 = vmatprep.mubr.msk.f32.mxu0 %vm1495_vm5, %v1496_v8 }
 0x638   :  { %1449 = vmatprep.subr.bf16.mxu0 %v1493_v3 }
 0x709   :  { %v738_v56 = vpop.f32.mrb[8].mxu0 }
 0x70a   :  { %v742_v57 = vadd.f32 %v738_v56, %v668_v55  ;;  %v1362_v58 = vpop.f32.mrb[9].mxu0 }
 0x70c   :  { %1481 = vtanh.f32 %v742_v57 }
 0x716   :  { %v1482_v59 = vpop.eup %1481 }
 0x717   :  { %1368 = vmatmul.mubr.msk.f32.vlgmr.msra.gmra.mrb[8].mxu1 %vm129_vm6, %v1482_v59 }
 0x718   :  { %1448 = vmatpush3.bf16.msk.msra.mxu1 %vm1555_vm4, %v1560_v7  ;;  %1381 = vmatprep.mubr.msk.f32.mxu1 %vm1495_vm5, %v1496_v8 }
 0x719   :  { %1453 = vmatprep.subr.bf16.mxu1 %v1493_v3 }
 0x7ea   :  { %v813_v60 = vpop.f32.mrb[8].mxu1 }
 0x7eb   :  { %v817_v61 = vadd.f32 %v813_v60, %v1589_v15  ;;  %v1369_v62 = vpop.f32.mrb[9].mxu1 }
 0x7ed   :  { %1483 = vtanh.f32 %v817_v61 }
 0x7f7   :  { %v1484_v63 = vpop.eup %1483 }
 0x7f8   :  { %820 = vst.msk [vmem:[#allocation3] sm:$0x3] %vm819_vm7, %v1484_v63  ;;  %1375 = vmatmul.mubr.msk.f32.vlgmr.msra.gmra.mrb[10].mxu0 %vm129_vm6, %v1484_v63 }
 0x7f9   :  { %1452 = vmatpush3.bf16.msk.msra.mxu0 %vm1555_vm4, %v1560_v7  ;;  %1388 = vmatprep.mubr.msk.f32.mxu0 %vm1495_vm5, %v1496_v8 }
 0x8cb   :  { %v890_v0 = vpop.f32.mrb[10].mxu0 }
 0x8cc   :  { %v894_v1 = vadd.f32 %v890_v0, %v1589_v15  ;;  %v1376_v2 = vpop.f32.mrb[11].mxu0 }
 0x8ce   :  { %1485 = vtanh.f32 %v894_v1 }
 0x8d8   :  { %v1486_v3 = vpop.eup %1485 }
 0x8d9   :  { %896 = vst.msk [vmem:[#allocation3 + $0x2] sm:$0x3] %vm819_vm7, %v1486_v3  ;;  %1382 = vmatmul.mubr.msk.f32.vlgmr.msra.gmra.mrb[10].mxu1 %vm129_vm6, %v1486_v3 }
 0x8da   :  { %1456 = vmatpush3.bf16.msk.msra.mxu1 %vm1555_vm4, %v1560_v7  ;;  %1395 = vmatprep.mubr.msk.f32.mxu1 %vm1495_vm5, %v1496_v8  ;;  %v31_v8 = vld [vmem:[%s1702_s5] sm:$0xff] }
 0x8db   :  { %v1457_v17 = vpack.c.bf16 %v32_v16, %v31_v8 }
 0x8dd   :  { %1459 = vmatprep.subr.msk.bf16.mxu0 %vm1555_vm4, %v1457_v17 }
 0x9ac   :  { %v966_v4 = vpop.f32.mrb[10].mxu1 }
 0x9ad   :  { %v970_v5 = vadd.f32 %v966_v4, %v1589_v15  ;;  %v1383_v9 = vpop.f32.mrb[11].mxu1 }
 0x9af   :  { %1487 = vtanh.f32 %v970_v5 }
 0x9b9   :  { %v1488_v10 = vpop.eup %1487 }
 0x9ba   :  { %972 = vst.msk [vmem:[#allocation3 + $0x4] sm:$0x3] %vm819_vm7, %v1488_v10  ;;  %1389 = vmatmul.mubr.msk.f32.vlgmr.msra.gmra.mrb[12].mxu0 %vm129_vm6, %v1488_v10 }
 0x9bb   :  { %1462 = vmatpush3.bf16.msk.msra.mxu0 %vm1555_vm4, %v1457_v17 }
 0xa8d   :  { %v1042_v11 = vpop.f32.mrb[12].mxu0 }
 0xa8e   :  { %v1046_v12 = vadd.f32 %v1042_v11, %v1589_v15  ;;  %v1390_v13 = vpop.f32.mrb[13].mxu0 }
 0xa90   :  { %1489 = vtanh.f32 %v1046_v12 }
 0xa9a   :  { %v1490_v14 = vpop.eup %1489 }
 0xa9b   :  { %1048 = vst.msk [vmem:[#allocation3 + $0x6] sm:$0x3] %vm819_vm7, %v1490_v14  ;;  %1396 = vmatmul.mubr.msk.f32.vlgmr.msra.gmra.mrb[12].mxu1 %vm129_vm6, %v1490_v14 }
 0xaa2   :  { %v1125_v7 = vld [vmem:[#allocation3] sm:$0xff] }
 0xaa3   :  { %1402 = vmatprep.mubr.msk.f32.mxu0 %vm129_vm6, %v1125_v7 }
 0xb6e   :  { %v1118_v18 = vpop.f32.mrb[12].mxu1 }
 0xb6f   :  { %v1122_v19 = vadd.f32 %v1118_v18, %v1589_v15  ;;  %v1397_v20 = vpop.f32.mrb[13].mxu1 }
 0xb71   :  { %1491 = vtanh.f32 %v1122_v19 }
 0xb7b   :  { %v1492_v21 = vpop.eup %1491 }
 0xb7c   :  { %1124 = vst.msk [vmem:[#allocation3 + $0x8] sm:$0x3] %vm819_vm7, %v1492_v21 }
 0xb83   :  { %v1126_v22 = vld [vmem:[#allocation3 + $0x8] sm:$0x3] }
 0xb84   :  { %1403 = vmatmul.mubr.msk.f32.vlgmr.msra.gmra.mrb[14].mxu0 %vm129_vm6, %v1126_v22 }
 0xc57   :  { %v1404_v24 = vpop.f32.mrb[14].mxu0 }
 0xc58   :  { %v1214_v25 = vadd.f32 %v1404_v24, %v1252_v23  ;;  %v1208_v6 = vpop.f32.mrb[15].mxu0 }
 0xc59   :  { %v1209_v26 = vadd.f32 %v1252_v23, %v1208_v6 }
 0xc5a   :  { %1219 = vst.msk [vmem:[%s1704_s7 + $0x8] sm:$0x3] %vm1218_vm8, %v1214_v25 }
 0xc5b   :  { %1217 = vst.msk [vmem:[%s1704_s7] sm:$0xff] %vm43_vm1, %v1209_v26 }

</bundles_post_ra>
